<compile_context>
chip_gen: v5e
topology: v5e:2x2
jax: 0.10.0
libtpu: 0.0.40
codegen_flags: <defaults>
</compile_context>

<pallas_src>
import math
import functools

import jax
import jax.numpy as jnp
from jax import lax
from jax.experimental import pallas as pl
from jax.experimental.pallas import tpu as pltpu


_MASK_VALUE = -1e30  # finite "neg-inf" for masked (padded) key positions


def _round_up(x, m):
    return ((x + m - 1) // m) * m


def _flash_attn_kernel(q_ref, k_ref, v_ref, o_ref,
                       q_sc, m_sc, l_sc, acc_sc,
                       *, scale, kv_len, tk, need_mask, compute_dtype):
    kv = pl.program_id(2)
    last_kv = pl.num_programs(2) - 1

    @pl.when(kv == 0)
    def _():
        # Per-(b, i) tile init.  The Q block is resident across the whole Tk
        # axis (its index_map ignores j), so fold the softmax scale into Q
        # exactly once and stash the bf16 MXU operand in VMEM scratch.
        m_sc[...] = jnp.full_like(m_sc, -jnp.inf)
        l_sc[...] = jnp.zeros_like(l_sc)
        acc_sc[...] = jnp.zeros_like(acc_sc)
        q_sc[...] = (q_ref[0] * scale).astype(q_sc.dtype)

    def step(apply_mask):
        q = q_sc[...]            # (tq, D_p)  pre-scaled, compute dtype (bf16)
        k = k_ref[0]             # (tk, D_p)  compute dtype (bf16)
        v = v_ref[0]             # (tk, Dv_p) compute dtype (bf16)

        # s = q @ k^T: contract the last dims (no explicit K transpose
        # relayout); bf16 operands, f32 accumulation on the MXU.
        s = lax.dot_general(q, k, (((1,), (1,)), ((), ())),
                            preferred_element_type=jnp.float32)   # (tq, tk)

        if apply_mask:
            key_pos = kv * tk + lax.broadcasted_iota(jnp.int32, s.shape, 1)
            s = jnp.where(key_pos < kv_len, s, _MASK_VALUE)

        m_prev = m_sc[...]
        m_new = jnp.maximum(m_prev, jnp.max(s, axis=-1, keepdims=True))
        alpha = jnp.exp(m_prev - m_new)           # softmax math stays f32
        p = jnp.exp(s - m_new)

        l_sc[...] = alpha * l_sc[...] + jnp.sum(p, axis=-1, keepdims=True)
        acc_sc[...] = alpha * acc_sc[...] + jnp.dot(
            p.astype(compute_dtype), v, preferred_element_type=jnp.float32)
        m_sc[...] = m_new

    if need_mask:
        # Padded key columns exist only in the final Tk tile: run the
        # iota/compare/select mask on that step alone; interior steps are
        # mask-free (pure VPU filler removal).
        @pl.when(kv != last_kv)
        def _():
            step(False)

        @pl.when(kv == last_kv)
        def _():
            step(True)
    else:
        step(False)

    @pl.when(kv == last_kv)
    def _():
        # Normalize once on the (tq, Dv) tile.  Exact reciprocal: runs once
        # per (b, i) tile, negligible cost, better parity with the reference.
        inv_l = pl.reciprocal(l_sc[...], approx=False)
        o_ref[0] = (acc_sc[...] * inv_l).astype(o_ref.dtype)


def attention(query, keys, values, *, tq=256, tk=256, use_bf16=True):
    """query: [B, Tq, D], keys: [B, Tk, D], values: [B, Tk, Dv] -> [B, Tq, Dv]"""
    B, Tq, D = query.shape
    Bk, Tk, Dk = keys.shape
    Bv, Tkv, Dv = values.shape
    assert B == Bk == Bv and D == Dk and Tk == Tkv

    # PyTorch module scales by 1/sqrt(query_dim) (original, unpadded D).
    scale = 1.0 / math.sqrt(D)

    compute_dtype = jnp.bfloat16 if use_bf16 else query.dtype

    # Tile sizes: tq sublane-aligned (x8), tk lane-aligned (x128; keep a
    # multiple of 256 when the problem allows for full MXU contraction depth
    # on v6e/v7x); both clamped to the padded problem size.
    tq = min(tq, _round_up(Tq, 8))
    tk = min(tk, _round_up(Tk, 128))

    Tq_p = _round_up(Tq, tq)
    Tk_p = _round_up(Tk, tk)
    D_p = _round_up(D, 128)
    Dv_p = _round_up(Dv, 128)
    # TODO(synk): if this module is used per-head with D << 128, fuse heads on
    # the caller side so the 128-lane contraction carries real data instead of
    # zero padding (padded lanes still cost MXU columns and HBM bytes).

    # Zero padding; padded keys are masked in-kernel (last Tk tile only),
    # padded D/Dv columns contribute zeros, padded query rows are sliced off.
    # K/V are streamed every inner step -> ship them in bf16 to halve the HBM
    # stream (they are bf16 MXU operands anyway).
    qp = jnp.pad(query, ((0, 0), (0, Tq_p - Tq), (0, D_p - D)))
    kp = jnp.pad(keys.astype(compute_dtype),
                 ((0, 0), (0, Tk_p - Tk), (0, D_p - D)))
    vp = jnp.pad(values.astype(compute_dtype),
                 ((0, 0), (0, Tk_p - Tk), (0, Dv_p - Dv)))

    need_mask = Tk_p != Tk

    kernel = functools.partial(
        _flash_attn_kernel,
        scale=scale, kv_len=Tk, tk=tk, need_mask=need_mask,
        compute_dtype=compute_dtype)

    grid = (B, Tq_p // tq, Tk_p // tk)

    # Advisory cost estimate for XLA's scheduler around the custom call.
    flops = 2 * B * Tq_p * Tk_p * (D_p + Dv_p)
    transcendentals = B * Tq_p * Tk_p
    bytes_accessed = (qp.size * qp.dtype.itemsize
                      + (Tq_p // tq) * (kp.size * kp.dtype.itemsize
                                        + vp.size * vp.dtype.itemsize)
                      + B * Tq_p * Dv_p * query.dtype.itemsize)

    out_p = pl.pallas_call(
        kernel,
        out_shape=jax.ShapeDtypeStruct((B, Tq_p, Dv_p), query.dtype),
        grid_spec=pltpu.PrefetchScalarGridSpec(
            num_scalar_prefetch=0,
            grid=grid,
            in_specs=[
                pl.BlockSpec((1, tq, D_p), lambda b, i, j: (b, i, 0)),
                pl.BlockSpec((1, tk, D_p), lambda b, i, j: (b, j, 0)),
                pl.BlockSpec((1, tk, Dv_p), lambda b, i, j: (b, j, 0)),
            ],
            # Output block independent of the reduction index j -> VMEM-resident
            # accumulator across the Tk axis.
            out_specs=pl.BlockSpec((1, tq, Dv_p), lambda b, i, j: (b, i, 0)),
            scratch_shapes=[
                pltpu.VMEM((tq, D_p), compute_dtype),   # pre-scaled Q (MXU op)
                pltpu.VMEM((tq, 1), jnp.float32),       # running max m
                pltpu.VMEM((tq, 1), jnp.float32),       # running denom l
                pltpu.VMEM((tq, Dv_p), jnp.float32),    # output accumulator
            ],
        ),
        compiler_params=pltpu.CompilerParams(
            dimension_semantics=("parallel", "parallel", "arbitrary"),
            vmem_limit_bytes=32 * 1024 * 1024,
        ),
        cost_estimate=pl.CostEstimate(
            flops=flops,
            transcendentals=transcendentals,
            bytes_accessed=bytes_accessed),
    )(qp, kp, vp)

    if Tq_p == Tq and Dv_p == Dv:
        return out_p            # no-op un-pad when caller shapes are aligned
    return out_p[:, :Tq, :Dv]


def attention_ref(query, keys, values):
    """Pure-JAX reference mirroring the PyTorch forward pass."""
    D = query.shape[-1]
    scale = 1.0 / math.sqrt(D)
    energy = jnp.einsum("bqd,bkd->bqk", query, keys) * scale
    energy = jax.nn.softmax(energy, axis=2)
    return jnp.einsum("bqk,bkv->bqv", energy, values)


if __name__ == "__main__":
    # Small shapes consistent with the module's bmm semantics.
    B, Tq, Tk, D, Dv = 2, 8, 8, 32, 32

    key = jax.random.PRNGKey(0)
    k1, k2, k3 = jax.random.split(key, 3)
    query = jax.random.normal(k1, (B, Tq, D), dtype=jnp.float32)
    keys = jax.random.normal(k2, (B, Tk, D), dtype=jnp.float32)
    values = jax.random.normal(k3, (B, Tk, Dv), dtype=jnp.float32)

    out = attention(query, keys, values)
    out = jax.block_until_ready(out)

    ref = attention_ref(query, keys, values)
    assert out.shape == (B, Tq, Dv)
    # bf16 MXU operands (Q/K/V/P) with f32 accumulation and f32 softmax math:
    # expected deviation from the pure-f32 reference is ~1e-3, well within 2e-2.
    assert jnp.allclose(out, ref, atol=2e-2, rtol=2e-2), "mismatch vs reference"

    print("KERNEL_OK")
</pallas_src>

<mosaic_0001>
module attributes {stable_mosaic.version = 11 : i64} {
  func.func @_flash_attn_kernel(%arg0: i32, %arg1: i32, %arg2: i32, %arg3: memref<1x8x128xf32, #tpu.memory_space<vmem>>, %arg4: memref<1x128x128xbf16, #tpu.memory_space<vmem>>, %arg5: memref<1x128x128xbf16, #tpu.memory_space<vmem>>, %arg6: memref<1x8x128xf32, #tpu.memory_space<vmem>>, %arg7: memref<8x128xbf16, #tpu.memory_space<vmem>>, %arg8: memref<8x1xf32, #tpu.memory_space<vmem>>, %arg9: memref<8x1xf32, #tpu.memory_space<vmem>>, %arg10: memref<8x128xf32, #tpu.memory_space<vmem>>) attributes {dimension_semantics = [#tpu.dimension_semantics<parallel>, #tpu.dimension_semantics<parallel>, #tpu.dimension_semantics<arbitrary>], iteration_bounds = array<i64: 2, 1, 1>, scalar_prefetch = 0 : i64, scratch_operands = 4 : i64, tpu.core_type = #tpu.core_type<tc>, window_params = [{transform_indices = @transform_0, window_bounds = array<i64: 1, 8, 128>}, {transform_indices = @transform_1, window_bounds = array<i64: 1, 128, 128>}, {transform_indices = @transform_2, window_bounds = array<i64: 1, 128, 128>}, {transform_indices = @transform_3, window_bounds = array<i64: 1, 8, 128>}]} {
    %c0_i32 = arith.constant 0 : i32
    %0 = arith.cmpi eq, %arg2, %c0_i32 : i32
    %1 = arith.extui %0 : i1 to i32
    %c0_i32_0 = arith.constant 0 : i32
    %2 = arith.cmpi ne, %1, %c0_i32_0 : i32
    scf.if %2 {
      %cst = arith.constant 0xFF800000 : f32
      %12 = vector.broadcast %cst : f32 to vector<8x1xf32>
      %c0 = arith.constant 0 : index
      %c0_7 = arith.constant 0 : index
      %13 = vector.load %arg8[%c0, %c0_7] : memref<8x1xf32, #tpu.memory_space<vmem>>, vector<8x1xf32>
      tpu.vector_store %arg8[%c0, %c0_7], %12 {strides = array<i32>} : memref<8x1xf32, #tpu.memory_space<vmem>>, vector<8x1xf32>,
      %cst_8 = arith.constant 0.000000e+00 : f32
      %14 = vector.broadcast %cst_8 : f32 to vector<8x1xf32>
      %c0_9 = arith.constant 0 : index
      %c0_10 = arith.constant 0 : index
      %15 = vector.load %arg9[%c0_9, %c0_10] : memref<8x1xf32, #tpu.memory_space<vmem>>, vector<8x1xf32>
      tpu.vector_store %arg9[%c0_9, %c0_10], %14 {strides = array<i32>} : memref<8x1xf32, #tpu.memory_space<vmem>>, vector<8x1xf32>,
      %cst_11 = arith.constant 0.000000e+00 : f32
      %16 = vector.broadcast %cst_11 : f32 to vector<8x128xf32>
      %c0_12 = arith.constant 0 : index
      %c0_13 = arith.constant 0 : index
      %17 = vector.load %arg10[%c0_12, %c0_13] : memref<8x128xf32, #tpu.memory_space<vmem>>, vector<8x128xf32>
      tpu.vector_store %arg10[%c0_12, %c0_13], %16 {strides = array<i32>} : memref<8x128xf32, #tpu.memory_space<vmem>>, vector<8x128xf32>,
      %c0_14 = arith.constant 0 : index
      %c0_15 = arith.constant 0 : index
      %c0_16 = arith.constant 0 : index
      %18 = vector.load %arg3[%c0_14, %c0_15, %c0_16] : memref<1x8x128xf32, #tpu.memory_space<vmem>>, vector<1x8x128xf32>
      %19 = vector.shape_cast %18 : vector<1x8x128xf32> to vector<8x128xf32>
      %cst_17 = arith.constant 0.176776692 : f32
      %20 = vector.broadcast %cst_17 : f32 to vector<8x128xf32>
      %21 = arith.mulf %19, %20 : vector<8x128xf32>
      %22 = arith.truncf %21 : vector<8x128xf32> to vector<8x128xbf16>
      %c0_18 = arith.constant 0 : index
      %c0_19 = arith.constant 0 : index
      %23 = vector.load %arg7[%c0_18, %c0_19] : memref<8x128xbf16, #tpu.memory_space<vmem>>, vector<8x128xbf16>
      tpu.vector_store %arg7[%c0_18, %c0_19], %22 {strides = array<i32>} : memref<8x128xbf16, #tpu.memory_space<vmem>>, vector<8x128xbf16>,
    } else {
    }
    %c0_i32_1 = arith.constant 0 : i32
    %3 = arith.cmpi ne, %arg2, %c0_i32_1 : i32
    %4 = arith.extui %3 : i1 to i32
    %c0_i32_2 = arith.constant 0 : i32
    %5 = arith.cmpi ne, %4, %c0_i32_2 : i32
    scf.if %5 {
      %c0 = arith.constant 0 : index
      %c0_7 = arith.constant 0 : index
      %12 = vector.load %arg7[%c0, %c0_7] : memref<8x128xbf16, #tpu.memory_space<vmem>>, vector<8x128xbf16>
      %c0_8 = arith.constant 0 : index
      %c0_9 = arith.constant 0 : index
      %c0_10 = arith.constant 0 : index
      %13 = vector.load %arg4[%c0_8, %c0_9, %c0_10] : memref<1x128x128xbf16, #tpu.memory_space<vmem>>, vector<1x128x128xbf16>
      %14 = vector.shape_cast %13 : vector<1x128x128xbf16> to vector<128x128xbf16>
      %c0_11 = arith.constant 0 : index
      %c0_12 = arith.constant 0 : index
      %c0_13 = arith.constant 0 : index
      %15 = vector.load %arg5[%c0_11, %c0_12, %c0_13] : memref<1x128x128xbf16, #tpu.memory_space<vmem>>, vector<1x128x128xbf16>
      %16 = vector.shape_cast %15 : vector<1x128x128xbf16> to vector<128x128xbf16>
      %cst = arith.constant dense<0.000000e+00> : vector<8x128xf32>
      %17 = tpu.matmul %12, %14, %cst {dimension_numbers = #tpu.dot_dimension_numbers<[1], [1], [0], [0], [0, 0, 1, 0], [], []>} : vector<8x128xbf16>, vector<128x128xbf16>, vector<8x128xf32> -> vector<8x128xf32>
      %c0_14 = arith.constant 0 : index
      %c0_15 = arith.constant 0 : index
      %18 = vector.load %arg8[%c0_14, %c0_15] : memref<8x1xf32, #tpu.memory_space<vmem>>, vector<8x1xf32>
      %cst_16 = arith.constant dense<0xFF800000> : vector<8xf32>
      %19 = vector.multi_reduction <maximumf>, %17, %cst_16 [1] : vector<8x128xf32> to vector<8xf32>
      %20 = vector.shape_cast %19 : vector<8xf32> to vector<8x1xf32>
      %21 = arith.maximumf %18, %20 : vector<8x1xf32>
      %22 = arith.subf %18, %21 : vector<8x1xf32>
      %23 = math.exp %22 : vector<8x1xf32>
      %24 = vector.broadcast %21 : vector<8x1xf32> to vector<8x128xf32>
      %25 = arith.subf %17, %24 : vector<8x128xf32>
      %26 = math.exp %25 : vector<8x128xf32>
      %c0_17 = arith.constant 0 : index
      %c0_18 = arith.constant 0 : index
      %27 = vector.load %arg9[%c0_17, %c0_18] : memref<8x1xf32, #tpu.memory_space<vmem>>, vector<8x1xf32>
      %28 = arith.mulf %23, %27 : vector<8x1xf32>
      %cst_19 = arith.constant dense<0.000000e+00> : vector<8xf32>
      %29 = vector.multi_reduction <add>, %26, %cst_19 [1] : vector<8x128xf32> to vector<8xf32>
      %30 = vector.shape_cast %29 : vector<8xf32> to vector<8x1xf32>
      %31 = arith.addf %28, %30 : vector<8x1xf32>
      %c0_20 = arith.constant 0 : index
      %c0_21 = arith.constant 0 : index
      %32 = vector.load %arg9[%c0_20, %c0_21] : memref<8x1xf32, #tpu.memory_space<vmem>>, vector<8x1xf32>
      tpu.vector_store %arg9[%c0_20, %c0_21], %31 {strides = array<i32>} : memref<8x1xf32, #tpu.memory_space<vmem>>, vector<8x1xf32>,
      %c0_22 = arith.constant 0 : index
      %c0_23 = arith.constant 0 : index
      %33 = vector.load %arg10[%c0_22, %c0_23] : memref<8x128xf32, #tpu.memory_space<vmem>>, vector<8x128xf32>
      %34 = vector.broadcast %23 : vector<8x1xf32> to vector<8x128xf32>
      %35 = arith.mulf %34, %33 : vector<8x128xf32>
      %36 = arith.truncf %26 : vector<8x128xf32> to vector<8x128xbf16>
      %cst_24 = arith.constant dense<0.000000e+00> : vector<8x128xf32>
      %37 = tpu.matmul %36, %16, %cst_24 {dimension_numbers = #tpu.dot_dimension_numbers<[1], [0], [0], [1], [0, 0, 1, 1], [], []>} : vector<8x128xbf16>, vector<128x128xbf16>, vector<8x128xf32> -> vector<8x128xf32>
      %38 = arith.addf %35, %37 : vector<8x128xf32>
      %c0_25 = arith.constant 0 : index
      %c0_26 = arith.constant 0 : index
      %39 = vector.load %arg10[%c0_25, %c0_26] : memref<8x128xf32, #tpu.memory_space<vmem>>, vector<8x128xf32>
      tpu.vector_store %arg10[%c0_25, %c0_26], %38 {strides = array<i32>} : memref<8x128xf32, #tpu.memory_space<vmem>>, vector<8x128xf32>,
      %c0_27 = arith.constant 0 : index
      %c0_28 = arith.constant 0 : index
      %40 = vector.load %arg8[%c0_27, %c0_28] : memref<8x1xf32, #tpu.memory_space<vmem>>, vector<8x1xf32>
      tpu.vector_store %arg8[%c0_27, %c0_28], %21 {strides = array<i32>} : memref<8x1xf32, #tpu.memory_space<vmem>>, vector<8x1xf32>,
    } else {
    }
    %c0_i32_3 = arith.constant 0 : i32
    %6 = arith.cmpi eq, %arg2, %c0_i32_3 : i32
    %7 = arith.extui %6 : i1 to i32
    %c0_i32_4 = arith.constant 0 : i32
    %8 = arith.cmpi ne, %7, %c0_i32_4 : i32
    scf.if %8 {
      %c0 = arith.constant 0 : index
      %c0_7 = arith.constant 0 : index
      %12 = vector.load %arg7[%c0, %c0_7] : memref<8x128xbf16, #tpu.memory_space<vmem>>, vector<8x128xbf16>
      %c0_8 = arith.constant 0 : index
      %c0_9 = arith.constant 0 : index
      %c0_10 = arith.constant 0 : index
      %13 = vector.load %arg4[%c0_8, %c0_9, %c0_10] : memref<1x128x128xbf16, #tpu.memory_space<vmem>>, vector<1x128x128xbf16>
      %14 = vector.shape_cast %13 : vector<1x128x128xbf16> to vector<128x128xbf16>
      %c0_11 = arith.constant 0 : index
      %c0_12 = arith.constant 0 : index
      %c0_13 = arith.constant 0 : index
      %15 = vector.load %arg5[%c0_11, %c0_12, %c0_13] : memref<1x128x128xbf16, #tpu.memory_space<vmem>>, vector<1x128x128xbf16>
      %16 = vector.shape_cast %15 : vector<1x128x128xbf16> to vector<128x128xbf16>
      %cst = arith.constant dense<0.000000e+00> : vector<8x128xf32>
      %17 = tpu.matmul %12, %14, %cst {dimension_numbers = #tpu.dot_dimension_numbers<[1], [1], [0], [0], [0, 0, 1, 0], [], []>} : vector<8x128xbf16>, vector<128x128xbf16>, vector<8x128xf32> -> vector<8x128xf32>
      %c128_i32 = arith.constant 128 : i32
      %18 = arith.muli %arg2, %c128_i32 : i32
      %19 = tpu.iota {dimensions = array<i32: 1>} : vector<8x128xi32>
      %20 = vector.broadcast %18 : i32 to vector<8x128xi32>
      %21 = arith.addi %20, %19 : vector<8x128xi32>
      %c8_i32 = arith.constant 8 : i32
      %22 = vector.broadcast %c8_i32 : i32 to vector<8x128xi32>
      %23 = arith.cmpi slt, %21, %22 : vector<8x128xi32>
      %cst_14 = arith.constant -1.000000e+30 : f32
      %24 = vector.broadcast %cst_14 : f32 to vector<8x128xf32>
      %25 = arith.select %23, %17, %24 : vector<8x128xi1>, vector<8x128xf32>
      %c0_15 = arith.constant 0 : index
      %c0_16 = arith.constant 0 : index
      %26 = vector.load %arg8[%c0_15, %c0_16] : memref<8x1xf32, #tpu.memory_space<vmem>>, vector<8x1xf32>
      %cst_17 = arith.constant dense<0xFF800000> : vector<8xf32>
      %27 = vector.multi_reduction <maximumf>, %25, %cst_17 [1] : vector<8x128xf32> to vector<8xf32>
      %28 = vector.shape_cast %27 : vector<8xf32> to vector<8x1xf32>
      %29 = arith.maximumf %26, %28 : vector<8x1xf32>
      %30 = arith.subf %26, %29 : vector<8x1xf32>
      %31 = math.exp %30 : vector<8x1xf32>
      %32 = vector.broadcast %29 : vector<8x1xf32> to vector<8x128xf32>
      %33 = arith.subf %25, %32 : vector<8x128xf32>
      %34 = math.exp %33 : vector<8x128xf32>
      %c0_18 = arith.constant 0 : index
      %c0_19 = arith.constant 0 : index
      %35 = vector.load %arg9[%c0_18, %c0_19] : memref<8x1xf32, #tpu.memory_space<vmem>>, vector<8x1xf32>
      %36 = arith.mulf %31, %35 : vector<8x1xf32>
      %cst_20 = arith.constant dense<0.000000e+00> : vector<8xf32>
      %37 = vector.multi_reduction <add>, %34, %cst_20 [1] : vector<8x128xf32> to vector<8xf32>
      %38 = vector.shape_cast %37 : vector<8xf32> to vector<8x1xf32>
      %39 = arith.addf %36, %38 : vector<8x1xf32>
      %c0_21 = arith.constant 0 : index
      %c0_22 = arith.constant 0 : index
      %40 = vector.load %arg9[%c0_21, %c0_22] : memref<8x1xf32, #tpu.memory_space<vmem>>, vector<8x1xf32>
      tpu.vector_store %arg9[%c0_21, %c0_22], %39 {strides = array<i32>} : memref<8x1xf32, #tpu.memory_space<vmem>>, vector<8x1xf32>,
      %c0_23 = arith.constant 0 : index
      %c0_24 = arith.constant 0 : index
      %41 = vector.load %arg10[%c0_23, %c0_24] : memref<8x128xf32, #tpu.memory_space<vmem>>, vector<8x128xf32>
      %42 = vector.broadcast %31 : vector<8x1xf32> to vector<8x128xf32>
      %43 = arith.mulf %42, %41 : vector<8x128xf32>
      %44 = arith.truncf %34 : vector<8x128xf32> to vector<8x128xbf16>
      %cst_25 = arith.constant dense<0.000000e+00> : vector<8x128xf32>
      %45 = tpu.matmul %44, %16, %cst_25 {dimension_numbers = #tpu.dot_dimension_numbers<[1], [0], [0], [1], [0, 0, 1, 1], [], []>} : vector<8x128xbf16>, vector<128x128xbf16>, vector<8x128xf32> -> vector<8x128xf32>
      %46 = arith.addf %43, %45 : vector<8x128xf32>
      %c0_26 = arith.constant 0 : index
      %c0_27 = arith.constant 0 : index
      %47 = vector.load %arg10[%c0_26, %c0_27] : memref<8x128xf32, #tpu.memory_space<vmem>>, vector<8x128xf32>
      tpu.vector_store %arg10[%c0_26, %c0_27], %46 {strides = array<i32>} : memref<8x128xf32, #tpu.memory_space<vmem>>, vector<8x128xf32>,
      %c0_28 = arith.constant 0 : index
      %c0_29 = arith.constant 0 : index
      %48 = vector.load %arg8[%c0_28, %c0_29] : memref<8x1xf32, #tpu.memory_space<vmem>>, vector<8x1xf32>
      tpu.vector_store %arg8[%c0_28, %c0_29], %29 {strides = array<i32>} : memref<8x1xf32, #tpu.memory_space<vmem>>, vector<8x1xf32>,
    } else {
    }
    %c0_i32_5 = arith.constant 0 : i32
    %9 = arith.cmpi eq, %arg2, %c0_i32_5 : i32
    %10 = arith.extui %9 : i1 to i32
    %c0_i32_6 = arith.constant 0 : i32
    %11 = arith.cmpi ne, %10, %c0_i32_6 : i32
    scf.if %11 {
      %c0 = arith.constant 0 : index
      %c0_7 = arith.constant 0 : index
      %12 = vector.load %arg9[%c0, %c0_7] : memref<8x1xf32, #tpu.memory_space<vmem>>, vector<8x1xf32>
      %13 = tpu.reciprocal %12 : vector<8x1xf32> -> vector<8x1xf32>
      %c0_8 = arith.constant 0 : index
      %c0_9 = arith.constant 0 : index
      %14 = vector.load %arg10[%c0_8, %c0_9] : memref<8x128xf32, #tpu.memory_space<vmem>>, vector<8x128xf32>
      %15 = vector.broadcast %13 : vector<8x1xf32> to vector<8x128xf32>
      %16 = arith.mulf %14, %15 : vector<8x128xf32>
      %c0_10 = arith.constant 0 : index
      %c0_11 = arith.constant 0 : index
      %c0_12 = arith.constant 0 : index
      %17 = vector.load %arg6[%c0_10, %c0_11, %c0_12] : memref<1x8x128xf32, #tpu.memory_space<vmem>>, vector<1x8x128xf32>
      %18 = vector.shape_cast %17 : vector<1x8x128xf32> to vector<8x128xf32>
      %19 = vector.shape_cast %16 : vector<8x128xf32> to vector<1x8x128xf32>
      tpu.vector_store %arg6[%c0_10, %c0_11, %c0_12], %19 {strides = array<i32>} : memref<1x8x128xf32, #tpu.memory_space<vmem>>, vector<1x8x128xf32>,
    } else {
    }
    return
  }
  func.func @transform_0(%arg0: i32, %arg1: i32, %arg2: i32) -> (i32, i32, i32) {
    %c0_i32 = arith.constant 0 : i32
    %c0_i32_0 = arith.constant 0 : i32
    return %arg0, %arg1, %c0_i32 : i32, i32, i32
  }
  func.func @transform_1(%arg0: i32, %arg1: i32, %arg2: i32) -> (i32, i32, i32) {
    %c0_i32 = arith.constant 0 : i32
    %c0_i32_0 = arith.constant 0 : i32
    return %arg0, %arg2, %c0_i32 : i32, i32, i32
  }
  func.func @transform_2(%arg0: i32, %arg1: i32, %arg2: i32) -> (i32, i32, i32) {
    %c0_i32 = arith.constant 0 : i32
    %c0_i32_0 = arith.constant 0 : i32
    return %arg0, %arg2, %c0_i32 : i32, i32, i32
  }
  func.func @transform_3(%arg0: i32, %arg1: i32, %arg2: i32) -> (i32, i32, i32) {
    %c0_i32 = arith.constant 0 : i32
    %c0_i32_0 = arith.constant 0 : i32
    return %arg0, %arg1, %c0_i32 : i32, i32, i32
  }
}

</mosaic_0001>

<bundles_post_ra>
// kernel: tpu_custom_call.1
= control target key start
LH: loop header
LB: loop body
LE: loop exit
PB: predicated region body
PF: predicated region fallthrough
CT: control target
= control target key end

     0   :  { %s1514_s0 = inlined_call_operand.hbm [shape: f32[2,8,128], index: 0, kind: input, shape index: {}]   ;;  %s1515_s1 = inlined_call_operand.hbm [shape: bf16[2,128,128], index: 1, kind: input, shape index: {}]   ;;  %s1516_s2 = inlined_call_operand.hbm [shape: bf16[2,128,128], index: 2, kind: input, shape index: {}]   ;;  %s1517_s3 = inlined_call_operand.hbm [shape: f32[2,8,128], index: 3, kind: output, shape index: {}]  }
   0x1   :  { %1520 = sst [smem:[#allocation19_spill]] %s1515_s1 }
   0x2   :  { %8 = vsyncpa [#allocation7], 0 }
   0x3   :  { %10 = vsyncpa [#allocation7 + $0x1], 0 }
   0x4   :  { %11 = vsyncpa [#allocation10], 0 }
   0x5   :  { %13 = vsyncpa [#allocation10 + $0x1], 0 }
   0x6   :  { %14 = vsyncpa [#allocation8], 0 }
   0x7   :  { %16 = vsyncpa [#allocation8 + $0x1], 0  ;;  %s1349_s12 = smov 0   ;;  %s1351_s13 = smov 0  }
   0x8   :  { %s1353_s14 = smov 0   ;;  %s1355_s15 = smov 0  }
   0x9   :  { %s1357_s16 = smov 0   ;;  %s1359_s17 = smov 0  }
   0xa LB: > { %1521 = sst [smem:[#allocation16_spill]] %s1310_s14  ;;  %s1380_s18 = sadd.s32 4294967295, %s1322_s17   ;;  %s1322_s17 = sphi %s1359_s17, %s22_s17   ;;  %s1318_s16 = sphi %s1357_s16, %s1536_s16   ;;  %s1314_s15 = sphi %s1355_s15, %s1535_s15   ;;  %s1310_s14 = sphi %s1353_s14, %s1531_s14   ;;  %s1306_s13 = sphi %s1351_s13, %s1534_s13   ;;  %s1302_s12 = sphi %s1349_s12, %s1533_s12  }
   0xb   : > { %s878_s19 = sadd.s32 4294967294, %s1322_s17   ;;  %s41_s20 = sadd.s32 1, %s1318_s16 }
   0xc   : > { %s50_s21 = sadd.s32 1, %s1310_s14  ;;  %p43_p0 = scmp.ge.s32.totalorder %s41_s20, 2 }
   0xd   : > { %p57_p1 = scmp.ne.s32.totalorder %s1310_s14, %s1306_s13  ;;  %p58_p2 = scmp.eq.s32.totalorder %s1322_s17, 0 }
   0xe   : > { %p63_p3 = scmp.ne.s32.totalorder %s1306_s13, %s1302_s12  ;;  %s1538_s20 = smov (%p43_p0, %s41_s20), 0 }
   0xf   : > { %1522 = sst [smem:[#allocation17_spill]] %s1538_s20  ;;  %p1392_p4 = por %p58_p2, %p57_p1 }
  0x10   : > { %p64_p5 = scmp.eq.s32.totalorder %s1380_s18, 0  ;;  %s45_s23 = ssub.s32 %s1318_s16, %s1538_s20 }
  0x11   : > { %p145_p6 = scmp.eq.s32.totalorder %s1380_s18, 1  ;;  %p48_p7 = scmp.eq.s32.totalorder %s45_s23, 0 }
  0x12   : > { %p1400_p8 = por %p64_p5, %p63_p3  ;;  %p151_p10 = scmp.eq.s32.totalorder %s878_s19, 1 }
  0x13   : > { %p1404_p9 = por %p145_p6, %p57_p1  ;;  %p880_p12 = scmp.ge.s32.totalorder %s1322_s17, 2 }
  0x14   : > { %s1409_s26 = scalar_select %p48_p7, %s1310_s14, %s50_s21  }
  0x15   : > { %p1411_p11 = por %p151_p10, %p63_p3  ;;  %p1082_p13 = scmp.lt.s32.totalorder %s1322_s17, 2 }
  0x16   : > { %1526 = sst [smem:[#allocation18_spill]] %s1409_s26  ;;  %s1418_s28 = sand.u32 1, %s1310_s14  }
  0x17   : > { %s191_s29 = sand.u32 1, %s1322_s17   ;;  %s883_s30 = sshll.u32 %s1418_s28, 6 }
  0x18   : > { %p1424_p0 = pnand %p1082_p13, %p1392_p4  ;;  %s1026_s5 = sshll.u32 %s1318_s16, 6 }
  0x19   : > { %s1529_s1 = sld [smem:[#allocation19_spill]]  ;;  %s195_s10 = scalar_lea.vmem [#allocation9], %s883_s30 }
  0x1a   : > { %s205_s11 = sshll.u32 %s195_s10, 4  ;;  %s192_s19 = scalar_lea.sflag [#allocation10], %s191_s29  ;;  %s206_s11 = int_to_ptr.vmem [resolvable:$true] %s205_s11 }
  0x1b   : > { %s1324_s21 = smov 64   ;;  %s1325_s22 = smov 4  }
  0x1c   : > { %s226_s26 = scalar_lea.hbm %s1516_s2, %s1026_s5  ;;  %s219_s7 = scalar_lea.vmem [#allocation11], %s883_s30 }
  0x1d   : > { %s227_s6 = sshll.u32 %s226_s26, 4  ;;  %p889_p1 = scmp.ge.s32.totalorder %s1322_s17, 1  ;;  %s228_s6 = int_to_ptr.hbm [resolvable:$true] %s227_s6 }
  0x1e   : > { %p237_p2 = scmp.lt.s32.totalorder %s1322_s17, 3  ;;  %s881_s29 = sshll.u32 %s1418_s28, 3 }
  0x1f   : > { %s202_s8 = scalar_lea.hbm %s1529_s1, %s1026_s5  ;;  %s882_s10 = sshll.u32 %s1318_s16, 3 }
  0x20   : > { %s203_s9 = sshll.u32 %s202_s8, 4  ;;  %s229_s8 = sshll.u32 %s219_s7, 4  ;;  %s204_s9 = int_to_ptr.hbm [resolvable:$true] %s203_s9  ;;  %s230_s8 = int_to_ptr.vmem [resolvable:$true] %s229_s8 }
  0x21   : > { %1074 = dma.hbm_to_vmem [thread:$0]  (!%p1424_p0), %s204_s9, 1024, %s206_s11, %s192_s19, %s1324_s21, %s1324_s21, %s1325_s22  }
  0x22   : > { %p238_p3 = pnand %p889_p1, %p237_p2  ;;  %s180_s9 = scalar_lea.hbm %s1514_s0, %s882_s10 }
  0x23   : > { %s182_s11 = sshll.u32 %s180_s9, 4  ;;  %s175_s20 = scalar_lea.vmem [#allocation6], %s881_s29  ;;  %s183_s11 = int_to_ptr.hbm [resolvable:$true] %s182_s11 }
  0x24   : > { %s184_s5 = sshll.u32 %s175_s20, 4  ;;  %s172_s26 = scalar_lea.sflag [#allocation7], %s1418_s28  ;;  %s185_s5 = int_to_ptr.vmem [resolvable:$true] %s184_s5 }
  0x25   : > { %1071 = dma.hbm_to_vmem [thread:$0]  (!%p1424_p0), %s183_s11, 128, %s185_s5, %s172_s26  }
  0x26   : > { %1077 = dma.hbm_to_vmem [thread:$0]  (!%p1424_p0), %s228_s6, 1024, %s230_s8, %s192_s19, %s1324_s21, %s1324_s21, %s1325_s22  }
  0x27   : > { %241 = sbr.rel (%p238_p3) target bundleno = 722 (0x2d2), region = 32  ;;  %s1450_s30 = sand.u32 (!%p238_p3), 1, %s1306_s13  }
  0x28   : > { %s890_s1 = sshll.u32 (!%p238_p3), %s1450_s30, 3  ;;  %s244_s14 = scalar_lea.sflag (!%p238_p3), [#allocation7], %s1450_s30 }
  0x29   : > { %s247_s23 = scalar_lea.vmem (!%p238_p3), [#allocation6], %s890_s1 }
  0x2c   : > { %1289 = dma.done.wait (%p1400_p8), %s244_s14, 128  }
  0x2d   : > { %1291 = vsyncadd (%p1400_p8), %s244_s14, 4294967168  ;;  %s253_s28 = sand.u32 1, %s1380_s18   ;;  %s891_s4 = sshll.u32 %s1450_s30, 6 }
  0x2e   : > { %s254_s19 = scalar_lea.sflag [#allocation10], %s253_s28  ;;  %s257_s21 = scalar_lea.vmem [#allocation9], %s891_s4 }
  0x2f   : > { %1293 = dma.done.wait (%p1400_p8), %s254_s19, 2048  }
  0x30   : > { %1295 = vsyncadd (%p1400_p8), %s254_s19, 4294965248  ;;  %v1051_v0 = vld [vmem:[%s257_s21 + $0x38] sm:$0xff]  ;;  %v1050_v1 = vld [vmem:[%s257_s21 + $0x30] sm:$0xff]  ;;  %vm307_vm0 = vcmask 7168   ;;  %v1326_v12 = vmov -inf   ;;  %v605_v13 = vlaneseq  ;;  %v1327_v18 = vmov 0  }
  0x31   : > { %591 = vmatpush.bf16.xpose.msra.mxu0 %v1051_v0  ;;  %v1049_v2 = vld [vmem:[%s257_s21 + $0x28] sm:$0xff]  ;;  %v311_v3 = vld [vmem:[%s247_s23] sm:$0xff]  ;;  %v1048_v5 = vld [vmem:[%s257_s21 + $0x20] sm:$0xff]  ;;  %308 = vst.msk [vmem:[#allocation3] sm:$0xff] %vm307_vm0, %v1326_v12  ;;  %1137 = vset.pattern.permute.xlu0 %v1327_v18  ;;  %v1328_v19 = vmov 0.0   ;;  %s267_s18 = scalar_lea.vmem [#allocation11], %s891_s4 }
  0x32   : > { %v312_v4 = vmul.f32 0.17677669, %v311_v3  ;;  %v1047_v7 = vld [vmem:[%s257_s21 + $0x18] sm:$0xff]  ;;  %v1046_v8 = vld [vmem:[%s257_s21 + $0x10] sm:$0xff]  ;;  %v1045_v9 = vld [vmem:[%s257_s21 + $0x8] sm:$0xff]  ;;  %v606_v14 = vand.u32 127, %v605_v13  ;;  %1138 = vset.pattern.permute.xlu1 %v1327_v18  ;;  %1139 = vset.pattern.permute.xlu2 %v1327_v18 }
  0x33   : > { %v1044_v10 = vld [vmem:[%s257_s21] sm:$0xff]  ;;  %309 = vst.msk [vmem:[#allocation4] sm:$0xff] %vm307_vm0, %v1328_v19  ;;  %v1059_v20 = vld [vmem:[%s267_s18 + $0x38] sm:$0xff]  ;;  %v1058_v21 = vld [vmem:[%s267_s18 + $0x30] sm:$0xff]  ;;  %s1023_s24 = sshll.u32 %s1314_s15, 3  ;;  %s300_s8 = scalar_lea.vmem [#allocation12], %s890_s1 }
  0x34   : > { %v313_v6 = vpack.c.bf16 %v312_v4, %v312_v4  ;;  %vm609_vm1 = vcmp.lt.s32.totalorder %v606_v14, 8  ;;  %689 = vmatpush.bf16.msra.mxu1 %v1059_v20  ;;  %v1057_v22 = vld [vmem:[%s267_s18 + $0x28] sm:$0xff]  ;;  %v1056_v23 = vld [vmem:[%s267_s18 + $0x20] sm:$0xff]  ;;  %v1055_v24 = vld [vmem:[%s267_s18 + $0x18] sm:$0xff]  ;;  %s740_s7 = scalar_lea.hbm %s1517_s3, %s1023_s24  ;;  %s742_s29 = sshll.u32 %s300_s8, 4  ;;  %s743_s29 = int_to_ptr.vmem [resolvable:$true] %s742_s29 }
  0x35   : > { %v1054_v29 = vld [vmem:[%s267_s18 + $0x10] sm:$0xff]  ;;  %v1053_v30 = vld [vmem:[%s267_s18 + $0x8] sm:$0xff]  ;;  %v1052_v31 = vld [vmem:[%s267_s18] sm:$0xff]  ;;  %s744_s10 = sshll.u32 %s740_s7, 4  ;;  %s729_s9 = scalar_lea.sflag [#allocation8], %s1450_s30  ;;  %s745_s10 = int_to_ptr.hbm [resolvable:$true] %s744_s10 }
  0x36   : > { %314 = vst [vmem:[#allocation2] sm:$0xf] %v313_v6  ;;  %s1250_s11 = sshra.s32 %s745_s10, 4  ;;  %s1256_s26 = scalar_lea.hbm %s1517_s3, 16  ;;  %s1251_s11 = int_to_ptr.hbm [resolvable:$true] %s1250_s11 }
  0x37   : > { %s1252_s15 = scalar_lea.hbm %s1251_s11, 8  ;;  %p1257_p7 = scmp.lt.s32.totalorder %s1251_s11, %s1517_s3 }
  0x38   : > { %690 = vmatpush.bf16.msra.mxu1 %v1058_v21  ;;  %v611_v25 = vld [vmem:[#allocation3] sm:$0xff]  ;;  %p1253_p4 = scmp.ne.s32.totalorder %s1251_s11, %s1252_s15  ;;  %p1258_p8 = scmp.lt.s32.totalorder %s1256_s26, %s1252_s15 }
  0x39   : > { %592 = vmatpush.bf16.xpose.msra.mxu0 %v1050_v1 }
  0x3a   : > { %v626_v39 = vld [vmem:[#allocation4] sm:$0xff]  ;;  %p1254_p5 = pnand %p1253_p4, %p1404_p9  ;;  %p1259_p10 = por %p1258_p8, %p1257_p7 }
  0x3c   : > { %691 = vmatpush.bf16.msra.mxu1 %v1057_v22  ;;  %p1255_p6 = pneg %p1254_p5 }
  0x3d   : > { %v510_v11 = vld [vmem:[#allocation2] sm:$0xf] }
  0x3e   : > { %p1260_p13 = pnand %p1259_p10, %p1255_p6 }
  0x40   : > { %692 = vmatpush.bf16.msra.mxu1 %v1056_v23 }
  0x41   : > { %593 = vmatpush.bf16.xpose.msra.mxu0 %v1049_v2 }
  0x44   : > { %693 = vmatpush.bf16.msra.mxu1 %v1055_v24 }
  0x48   : > { %694 = vmatpush.bf16.msra.mxu1 %v1054_v29 }
  0x49   : > { %594 = vmatpush.bf16.xpose.msra.mxu0 %v1048_v5 }
  0x4c   : > { %695 = vmatpush.bf16.msra.mxu1 %v1053_v30 }
  0x50   : > { %696 = vmatpush.bf16.msra.mxu1 %v1052_v31 }
  0x51   : > { %595 = vmatpush.bf16.xpose.msra.mxu0 %v1047_v7 }
  0x59   : > { %596 = vmatpush.bf16.xpose.msra.mxu0 %v1046_v8 }
  0x61   : > { %597 = vmatpush.bf16.xpose.msra.mxu0 %v1045_v9 }
  0x69   : > { %598 = vmatpush.bf16.xpose.msra.mxu0 %v1044_v10 }
  0x70   : > { %599 = vmatmul.bf16.vlgmr.msra.gmra.mxu0 %v510_v11 }
  0xed   : > { %v600_v15 = vpop.f32.mrf.mxu0 }
  0xee   : > { %v610_v16 = vsel %vm609_vm1, %v600_v15, -1e+30 }
  0xef   : > { %612 = vmax.xlane.f32.xlu0 %v610_v16 }
  0xf5   : > { %v602_v17 = vpop.f32.mrf.mxu0 }
 0x162   : > { %v613_v26 = vpop.xlane.xlu0 %612 }
 0x163   : > { %v614_v27 = vmax.f32 %v611_v25, %v613_v26 }
 0x165   : > { %v615_v28 = vsub.f32 %v611_v25, %v614_v27  ;;  %704 = vst.msk [vmem:[#allocation3] sm:$0xff] %vm307_vm0, %v614_v27  ;;  %620 = vperm.xlu0 %1137, %v614_v27  }
 0x167   : > { %v616_v37 = vmul.f32 1.442695, %v615_v28 }
 0x1d7   : > { %v621_v32 = vpop.permute.xlu0 %620 }
 0x1d8   : > { %v623_v33 = vsub.f32 %v610_v16, %v621_v32 }
 0x1da   : > { %v624_v34 = vmul.f32 1.442695, %v623_v33 }
 0x1dc   : > { %1140 = vpow2.f32 %v624_v34 }
 0x1dd   : > { %1142 = vpow2.f32 %v616_v37 }
 0x1e2   : > { %v1141_v35 = vpop.eup %1140 }
 0x1e3   : > { %628 = vadd.xlane.f32.xlu1 %v1141_v35  ;;  %v640_v36 = vpack.c.bf16 %v1141_v35, %v1141_v35  ;;  %v1143_v38 = vpop.eup %1142 }
 0x1e4   : > { %v627_v40 = vmul.f32 %v1143_v38, %v626_v39 }
 0x1e5   : > { %697 = vmatmul.bf16.vlgmr.msra.gmra.mxu1 %v640_v36 }
 0x1fc   : > { %636 = vperm.xlu1 %1138, %v1143_v38  }
 0x256   : > { %v629_v41 = vpop.xlane.xlu1 %628 }
 0x257   : > { %v630_v42 = vadd.f32 %v629_v41, %v627_v40 }
 0x259   : > { %632 = vst.msk [vmem:[#allocation4] sm:$0xff] %vm307_vm0, %v630_v42 }
 0x260   : > { %v705_v43 = vld [vmem:[#allocation4] sm:$0xff] }
 0x261   : > { %1144 = vrcp.f32 %v705_v43  ;;  %v717_v49 = vand.u32 2147483648, %v705_v43  ;;  %v715_v51 = vand.u32 2147483647, %v705_v43  ;;  %vm711_vm3 = vweird.f32 %v705_v43 }
 0x262   : > { %v698_v44 = vpop.f32.mrf.mxu1 }
 0x263   : > { %v718_v53 = vor.u32 1.1754944e-38, %v717_v49  ;;  %vm716_vm5 = vcmp.eq.f32.partialorder %v715_v51, 8.507059e+37 }
 0x267   : > { %v1145_v45 = vpop.eup %1144 }
 0x268   : > { %v707_v46 = vmul.f32 %v1145_v45, %v705_v43  ;;  %vm712_vm2 = vweird.f32 %v1145_v45 }
 0x269   : > { %vm713_vm4 = vmor %vm711_vm3, %vm712_vm2 }
 0x26a   : > { %v700_v47 = vpop.f32.mrf.mxu1  ;;  %v708_v48 = vsub.f32 1.0, %v707_v46 }
 0x26c   : > { %v709_v50 = vmul.f32 %v1145_v45, %v708_v48 }
 0x26e   : > { %v710_v52 = vadd.f32 %v1145_v45, %v709_v50  ;;  %v637_v56 = vpop.permute.xlu1 %636 }
 0x26f   : > { %v639_v57 = vmul.f32 0.0, %v637_v56 }
 0x270   : > { %v714_v54 = vsel %vm713_vm4, %v1145_v45, %v710_v52 }
 0x271   : > { %v719_v55 = vsel %vm716_vm5, %v718_v53, %v714_v54  ;;  %v702_v58 = vadd.f32 %v698_v44, %v639_v57 }
 0x272   : > { %723 = vperm.xlu2 %1139, %v719_v55  }
 0x2cc   : > { %v724_v59 = vpop.permute.xlu2 %723 }
 0x2cd   : > { %v726_v60 = vmul.f32 %v724_v59, %v702_v58 }
 0x2cf   : > { %727 = vst [vmem:[%s300_s8] sm:$0xff] %v726_v60 }
 0x2d0   : > { %1263 = shalt.err (!%p1260_p13)
}
 0x2d1   : > { %1066 = dma.vmem_to_hbm [thread:$0]  (%p1404_p9), %s743_s29, 128, %s745_s10, %s729_s9  }
 0x2d2 PF: > { %s756_s30 = sand.u32 1, %s1302_s12   ;;  %p1079_p0 = pnand %p880_p12, %p1411_p11 }
 0x2d3   : > { %s757_s23 = scalar_lea.sflag [#allocation8], %s756_s30 }
 0x2d4   : > { %p1080_p1 = pneg %p1079_p0 }
 0x2d6   : > { %1297 = dma.done.wait (%p1080_p1), %s757_s23, 128  }
 0x2d7   : > { %1299 = vsyncadd (%p1080_p1), %s757_s23, 4294967168  ;;  %s22_s17 = sadd.s32 1, %s1322_s17   ;;  %s1530_s28 = sld [smem:[#allocation16_spill]] }
 0x2d8   : > { %p19_p2 = scmp.ge.s32.totalorder %s22_s17, 4   ;;  %s1531_s14 = sld [smem:[#allocation18_spill]] }
 0x2d9   : > { %s1532_s25 = sld [smem:[#allocation17_spill]]  ;;  %s1533_s12 = smov %s1306_s13 }
 0x2da   : > { %s1535_s15 = smov %s1318_s16 }
 0x2db   :  { %21 = sbr.rel (!%p19_p2) target bundleno = 10 (0xa), region = 113 }
 0x2dd   : > { %s1534_s13 = smov %s1530_s28 }
 0x2df   : > { %s1536_s16 = smov %s1532_s25 }
 0x2e0   :  { %763 = vsyncpa [#allocation7], 1 }
 0x2e1   :  { %765 = vsyncpa [#allocation7 + $0x1], 1 }
 0x2e2   :  { %766 = vsyncpa [#allocation10], 1 }
 0x2e3   :  { %768 = vsyncpa [#allocation10 + $0x1], 1 }
 0x2e4   :  { %769 = vsyncpa [#allocation8], 1 }
 0x2e5   :  { %771 = vsyncpa [#allocation8 + $0x1], 1 }

</bundles_post_ra>
